<compile_context>
chip_gen: v7x
topology: tpu7x:2x2x1
jax: 0.10.0
libtpu: 0.0.40
codegen_flags: <defaults>
</compile_context>

<pallas_src>
import math
import functools

import jax
import jax.numpy as jnp
from jax.experimental import pallas as pl
from jax.experimental.pallas import tpu as pltpu


_VMEM_LIMIT = 48 * 1024 * 1024   # < v7x's 64 MiB/TC; raises v5e's 16 MiB scoped default


def _pick_tile(dim, target):
    """Largest tile <= target that divides dim and is a multiple of 8 (else dim)."""
    if dim <= target:
        return dim
    for t in range(target, 7, -1):
        if dim % t == 0 and t % 8 == 0:
            return t
    return dim


# ---------------------------------------------------------------------------
# Kernel 1: fused Q / K / V projections.
# ---------------------------------------------------------------------------
def _proj_kernel(x_ref, wf_ref, bf_ref, w2_ref, b2_ref, q_ref, kv_ref, *,
                 nhd, scale):
    x = x_ref[0]                                                   # (TR, H) bf16
    # Single wide MXU pass: [q_pre | key_hidden_pre | value_hidden_pre]
    h = jnp.dot(x, wf_ref[...], preferred_element_type=jnp.float32) + bf_ref[0]
    # Query: bias already included; fold the 1/sqrt(d+1) score scale here.
    q_ref[0] = (h[:, :nhd] * scale).astype(q_ref.dtype)
    # key / value MLP second stage as ONE block-diagonal matmul so [k | v] comes
    # out as a single lane-dense slab (one unmasked store, one big MXU push).
    hkv = jnp.maximum(h[:, nhd:], 0.0).astype(w2_ref.dtype)        # ReLU, bf16
    kv = jnp.dot(hkv, w2_ref[...], preferred_element_type=jnp.float32) + b2_ref[0]
    kv_ref[0] = kv.astype(kv_ref.dtype)


# ---------------------------------------------------------------------------
# Kernel 2: flash-style attention + output dense + residual + LayerNorm.
# ---------------------------------------------------------------------------
def _attn_kernel(x_ref, q_ref, kv_ref, wo_ref, bo_ref, gamma_ref, beta_ref,
                 o_ref, qs_sc, m_sc, l_sc, acc_sc, *,
                 num_heads, head_dim, q_tile, ln_eps):
    ki = pl.program_id(2)

    @pl.when(ki == 0)
    def _init():
        m_sc[...] = jnp.full(m_sc.shape, -jnp.inf, dtype=m_sc.dtype)
        l_sc[...] = jnp.zeros(l_sc.shape, dtype=l_sc.dtype)
        acc_sc[...] = jnp.zeros(acc_sc.shape, dtype=acc_sc.dtype)
        # Re-lay the resident q tile (TQ, nh*d) into head-stacked form (nh*TQ, d)
        # ONCE per (b, qi) so the hot kv loop has no per-head work at all.
        q = q_ref[0]
        for n in range(num_heads):
            qs_sc[pl.ds(n * q_tile, q_tile), :] = q[:, n * head_dim:(n + 1) * head_dim]

    kv = kv_ref[0]                                                 # (TK, 2*d) bf16
    k = kv[:, :head_dim]
    v = kv[:, head_dim:]

    # All heads in one shot: (nh*TQ, d) x (TK, d)^T -> (nh*TQ, TK) f32 scores.
    s = jnp.einsum('md,td->mt', qs_sc[...], k,
                   preferred_element_type=jnp.float32)
    m_prev = m_sc[...]                                             # (nh*TQ, 1)
    m_new = jnp.maximum(m_prev, jnp.max(s, axis=-1, keepdims=True))
    alpha = jnp.exp(m_prev - m_new)
    p = jnp.exp(s - m_new)                                         # (nh*TQ, TK)
    l_sc[...] = alpha * l_sc[...] + jnp.sum(p, axis=-1, keepdims=True)
    acc_sc[...] = alpha * acc_sc[...] + jnp.dot(
        p.astype(v.dtype), v, preferred_element_type=jnp.float32)  # (nh*TQ, d)
    m_sc[...] = m_new

    @pl.when(ki == pl.num_programs(2) - 1)
    def _finalize():
        # residual + output bias, then fused per-head output projection:
        #   ctx @ Wo == sum_n ctx_n @ Wo[n*d:(n+1)*d, :]   (no lane concat needed;
        #   per-head slices of the stacked ctx are sublane-aligned -> free views)
        out = x_ref[0].astype(jnp.float32) + bo_ref[0]
        ctx = (acc_sc[...] * pl.reciprocal(l_sc[...], approx=True)
               ).astype(wo_ref.dtype)                              # (nh*TQ, d) bf16
        for n in range(num_heads):
            out = out + jnp.dot(ctx[n * q_tile:(n + 1) * q_tile, :],
                                wo_ref[n * head_dim:(n + 1) * head_dim, :],
                                preferred_element_type=jnp.float32)
        # single-pass LayerNorm: var = E[x^2] - mu^2
        hidden = out.shape[-1]
        s1 = jnp.sum(out, axis=-1, keepdims=True)
        s2 = jnp.sum(out * out, axis=-1, keepdims=True)
        mu = s1 * (1.0 / hidden)
        var = s2 * (1.0 / hidden) - mu * mu
        normed = (out - mu) * jax.lax.rsqrt(var + ln_eps)
        o_ref[0] = (normed * gamma_ref[0] + beta_ref[0]).astype(o_ref.dtype)


# ---------------------------------------------------------------------------
# Wrapper
# ---------------------------------------------------------------------------
def roberta_attention(x, params, *, num_heads, head_dim, ln_eps=1e-12,
                      row_tile=256, q_tile=256, k_tile=512):
    """RobertaAttention forward (eval mode, no attention/head mask)."""
    # TODO(synk): attention_mask / head_mask / output_attentions and train-mode
    # dropout are not implemented (they are None/False/identity in the default
    # inference forward of the reference module).
    B, S, H = x.shape
    (wq, bq, wk1, bk1, wk2, bk2, wv1, bv1, wv2, bv2, wo, bo, gamma, beta) = params
    nhd = num_heads * head_dim
    d2 = 2 * head_dim
    scale = 1.0 / math.sqrt(head_dim + 1)      # sqrt(head_size + 1), as in source
    cdt = jnp.bfloat16                         # MXU compute dtype
    f32 = jnp.float32

    # --- parameter packing (done once, outside the kernels) ---
    wf = jnp.concatenate([wq, wk1, wv1], axis=1).astype(cdt)       # (H, nhd + 4H)
    bf = jnp.concatenate([bq, bk1, bv1], axis=1).astype(f32)       # (1, nhd + 4H)
    w2 = jnp.concatenate(                                          # (4H, 2d) block-diag
        [jnp.concatenate([wk2, jnp.zeros_like(wk2)], axis=1),
         jnp.concatenate([jnp.zeros_like(wv2), wv2], axis=1)], axis=0).astype(cdt)
    b2 = jnp.concatenate([bk2, bv2], axis=1).astype(f32)           # (1, 2d)
    wo_c, bo_c = wo.astype(cdt), bo.astype(f32)
    gamma_c, beta_c = gamma.astype(f32), beta.astype(f32)
    x_c = x.astype(cdt)

    tr = _pick_tile(S, row_tile)
    tq = _pick_tile(S, q_tile)
    tk = _pick_tile(S, k_tile)

    # NOTE: the weight blocks below use constant index maps (re-used every grid
    # step); bf16 halves their footprint.  pl.Buffered(1) could single-buffer
    # them if more VMEM headroom is ever needed at production sizes.
    def rep2(a):
        return pl.BlockSpec(a.shape, lambda b, i: (0,) * a.ndim)

    def rep3(a):
        return pl.BlockSpec(a.shape, lambda b, qi, ki: (0,) * a.ndim)

    # ---- kernel 1: fused projections ----
    q_arr, kv_arr = pl.pallas_call(
        functools.partial(_proj_kernel, nhd=nhd, scale=scale),
        out_shape=(jax.ShapeDtypeStruct((B, S, nhd), cdt),
                   jax.ShapeDtypeStruct((B, S, d2), cdt)),
        grid_spec=pltpu.PrefetchScalarGridSpec(
            num_scalar_prefetch=0,
            grid=(B, S // tr),
            in_specs=[
                pl.BlockSpec((1, tr, H), lambda b, i: (b, i, 0)),
                rep2(wf), rep2(bf), rep2(w2), rep2(b2),
            ],
            out_specs=[
                pl.BlockSpec((1, tr, nhd), lambda b, i: (b, i, 0)),
                pl.BlockSpec((1, tr, d2), lambda b, i: (b, i, 0)),
            ]),
        compiler_params=pltpu.CompilerParams(
            dimension_semantics=("parallel", "parallel"),
            vmem_limit_bytes=_VMEM_LIMIT),
    )(x_c, wf, bf, w2, b2)

    # ---- kernel 2: attention + self-output ----
    out = pl.pallas_call(
        functools.partial(_attn_kernel, num_heads=num_heads,
                          head_dim=head_dim, q_tile=tq, ln_eps=ln_eps),
        out_shape=jax.ShapeDtypeStruct((B, S, H), x.dtype),
        grid_spec=pltpu.PrefetchScalarGridSpec(
            num_scalar_prefetch=0,
            grid=(B, S // tq, S // tk),
            in_specs=[
                pl.BlockSpec((1, tq, H), lambda b, qi, ki: (b, qi, 0)),    # residual (f32)
                pl.BlockSpec((1, tq, nhd), lambda b, qi, ki: (b, qi, 0)),  # q (bf16)
                pl.BlockSpec((1, tk, d2), lambda b, qi, ki: (b, ki, 0)),   # [k | v] (bf16)
                rep3(wo_c), rep3(bo_c), rep3(gamma_c), rep3(beta_c),
            ],
            out_specs=pl.BlockSpec((1, tq, H), lambda b, qi, ki: (b, qi, 0)),
            scratch_shapes=[
                pltpu.VMEM((num_heads * tq, head_dim), cdt),          # head-stacked Q
                pltpu.VMEM((num_heads * tq, 1), jnp.float32),         # running max
                pltpu.VMEM((num_heads * tq, 1), jnp.float32),         # running sum
                pltpu.VMEM((num_heads * tq, head_dim), jnp.float32),  # context acc
            ]),
        compiler_params=pltpu.CompilerParams(
            dimension_semantics=("parallel", "parallel", "arbitrary"),
            vmem_limit_bytes=_VMEM_LIMIT),
    )(x, q_arr, kv_arr, wo_c, bo_c, gamma_c, beta_c)
    return out


# ---------------------------------------------------------------------------
# Pure-JAX reference mirroring the PyTorch forward (eval mode, f32).
# ---------------------------------------------------------------------------
def reference(x, params, *, num_heads, head_dim, ln_eps=1e-12):
    (wq, bq, wk1, bk1, wk2, bk2, wv1, bv1, wv2, bv2, wo, bo, gamma, beta) = params
    B, S, H = x.shape
    q = (jnp.einsum('bsh,ho->bso', x, wq) + bq).reshape(B, S, num_heads, head_dim)
    q = jnp.transpose(q, (0, 2, 1, 3))                               # (B, nh, S, d)
    k = jnp.maximum(jnp.einsum('bsh,hm->bsm', x, wk1) + bk1, 0.0)
    k = jnp.einsum('bsm,md->bsd', k, wk2) + bk2                      # (B, S, d)
    v = jnp.maximum(jnp.einsum('bsh,hm->bsm', x, wv1) + bv1, 0.0)
    v = jnp.einsum('bsm,md->bsd', v, wv2) + bv2
    scores = jnp.einsum('bnsd,btd->bnst', q, k) / math.sqrt(head_dim + 1)
    probs = jax.nn.softmax(scores, axis=-1)
    ctx = jnp.einsum('bnst,btd->bnsd', probs, v)
    ctx = jnp.transpose(ctx, (0, 2, 1, 3)).reshape(B, S, H)
    out = jnp.einsum('bsh,ho->bso', ctx, wo) + bo + x
    mu = jnp.mean(out, axis=-1, keepdims=True)
    var = jnp.mean((out - mu) ** 2, axis=-1, keepdims=True)
    return (out - mu) / jnp.sqrt(var + ln_eps) * gamma[0] + beta[0]


if __name__ == "__main__":
    # Small config: hidden=32, heads=4, head_dim=8, mlp_dim=2*hidden=64, seq=8, batch=2
    B, S, H = 2, 8, 32
    NH = 4
    D = H // NH
    M = 2 * H

    key = jax.random.PRNGKey(0)
    keys = jax.random.split(key, 11)
    f32 = jnp.float32

    x = jax.random.normal(keys[0], (B, S, H), f32)

    # Deterministic parameter init (shapes from module __init__)
    wq  = jax.random.normal(keys[1], (H, NH * D), f32) * 0.1   # LinearGeneral (H, nh, d) flattened
    bq  = jnp.zeros((1, NH * D), f32)
    wk1 = jax.random.normal(keys[2], (H, M), f32) * 0.1
    bk1 = jax.random.normal(keys[3], (1, M), f32) * 0.01
    wk2 = jax.random.normal(keys[4], (M, D), f32) * 0.1
    bk2 = jnp.zeros((1, D), f32)
    wv1 = jax.random.normal(keys[5], (H, M), f32) * 0.1
    bv1 = jax.random.normal(keys[6], (1, M), f32) * 0.01
    wv2 = jax.random.normal(keys[7], (M, D), f32) * 0.1
    bv2 = jnp.zeros((1, D), f32)
    wo  = jax.random.normal(keys[8], (H, H), f32) * 0.1
    bo  = jax.random.normal(keys[9], (1, H), f32) * 0.01
    gamma = jnp.ones((1, H), f32)
    beta  = jnp.zeros((1, H), f32)

    params = (wq, bq, wk1, bk1, wk2, bk2, wv1, bv1, wv2, bv2, wo, bo, gamma, beta)

    # --- test 1: single-tile path (S == tile) ---
    out = roberta_attention(x, params, num_heads=NH, head_dim=D)
    out = jax.block_until_ready(out)
    ref = reference(x, params, num_heads=NH, head_dim=D)
    assert out.shape == (B, S, H)
    assert jnp.allclose(out, ref, atol=3e-2, rtol=3e-2), "mismatch vs JAX reference (test 1)"

    # --- test 2: exercise the tiled / online-softmax path (multiple K and Q tiles) ---
    S2 = 16
    x2 = jax.random.normal(keys[10], (1, S2, H), f32)
    out2 = roberta_attention(x2, params, num_heads=NH, head_dim=D,
                             row_tile=8, q_tile=8, k_tile=8)
    out2 = jax.block_until_ready(out2)
    ref2 = reference(x2, params, num_heads=NH, head_dim=D)
    assert out2.shape == (1, S2, H)
    assert jnp.allclose(out2, ref2, atol=3e-2, rtol=3e-2), "mismatch vs JAX reference (test 2)"

    print("KERNEL_OK")
</pallas_src>

<mosaic_0001>
module attributes {stable_mosaic.version = 11 : i64} {
  func.func @_proj_kernel(%arg0: i32, %arg1: i32, %arg2: memref<1x8x32xbf16, #tpu.memory_space<vmem>>, %arg3: memref<32x160xbf16, #tpu.memory_space<vmem>>, %arg4: memref<1x160xf32, #tpu.memory_space<vmem>>, %arg5: memref<128x16xbf16, #tpu.memory_space<vmem>>, %arg6: memref<1x16xf32, #tpu.memory_space<vmem>>, %arg7: memref<1x8x32xbf16, #tpu.memory_space<vmem>>, %arg8: memref<1x8x16xbf16, #tpu.memory_space<vmem>>) attributes {dimension_semantics = [#tpu.dimension_semantics<parallel>, #tpu.dimension_semantics<parallel>], iteration_bounds = array<i64: 2, 1>, scalar_prefetch = 0 : i64, scratch_operands = 0 : i64, tpu.core_type = #tpu.core_type<tc>, window_params = [{transform_indices = @transform_0, window_bounds = array<i64: 1, 8, 32>}, {pipeline_mode = #tpu.pipeline_mode<synchronous>, transform_indices = @transform_1, window_bounds = array<i64: 32, 160>}, {pipeline_mode = #tpu.pipeline_mode<synchronous>, transform_indices = @transform_2, window_bounds = array<i64: 1, 160>}, {pipeline_mode = #tpu.pipeline_mode<synchronous>, transform_indices = @transform_3, window_bounds = array<i64: 128, 16>}, {pipeline_mode = #tpu.pipeline_mode<synchronous>, transform_indices = @transform_4, window_bounds = array<i64: 1, 16>}, {transform_indices = @transform_5, window_bounds = array<i64: 1, 8, 32>}, {transform_indices = @transform_6, window_bounds = array<i64: 1, 8, 16>}]} {
    %c0 = arith.constant 0 : index
    %c0_0 = arith.constant 0 : index
    %c0_1 = arith.constant 0 : index
    %0 = vector.load %arg2[%c0, %c0_0, %c0_1] : memref<1x8x32xbf16, #tpu.memory_space<vmem>>, vector<1x8x32xbf16>
    %1 = vector.shape_cast %0 : vector<1x8x32xbf16> to vector<8x32xbf16>
    %c0_2 = arith.constant 0 : index
    %c0_3 = arith.constant 0 : index
    %2 = vector.load %arg3[%c0_2, %c0_3] : memref<32x160xbf16, #tpu.memory_space<vmem>>, vector<32x160xbf16>
    %cst = arith.constant dense<0.000000e+00> : vector<8x160xf32>
    %3 = tpu.matmul %1, %2, %cst {dimension_numbers = #tpu.dot_dimension_numbers<[1], [0], [0], [1], [0, 0, 1, 1], [], []>} : vector<8x32xbf16>, vector<32x160xbf16>, vector<8x160xf32> -> vector<8x160xf32>
    %c0_4 = arith.constant 0 : index
    %c0_5 = arith.constant 0 : index
    %4 = vector.load %arg4[%c0_4, %c0_5] : memref<1x160xf32, #tpu.memory_space<vmem>>, vector<1x160xf32>
    %5 = vector.shape_cast %4 : vector<1x160xf32> to vector<160xf32>
    %6 = vector.shape_cast %5 : vector<160xf32> to vector<1x160xf32>
    %7 = vector.broadcast %6 : vector<1x160xf32> to vector<8x160xf32>
    %8 = arith.addf %3, %7 : vector<8x160xf32>
    %9 = vector.extract_strided_slice %8 {offsets = [0, 0], sizes = [8, 32], strides = [1, 1]} : vector<8x160xf32> to vector<8x32xf32>
    %cst_6 = arith.constant 0.333333343 : f32
    %10 = vector.broadcast %cst_6 : f32 to vector<8x32xf32>
    %11 = arith.mulf %9, %10 : vector<8x32xf32>
    %12 = arith.truncf %11 : vector<8x32xf32> to vector<8x32xbf16>
    %c0_7 = arith.constant 0 : index
    %c0_8 = arith.constant 0 : index
    %c0_9 = arith.constant 0 : index
    %13 = vector.load %arg7[%c0_7, %c0_8, %c0_9] : memref<1x8x32xbf16, #tpu.memory_space<vmem>>, vector<1x8x32xbf16>
    %14 = vector.shape_cast %13 : vector<1x8x32xbf16> to vector<8x32xbf16>
    %15 = vector.shape_cast %12 : vector<8x32xbf16> to vector<1x8x32xbf16>
    tpu.vector_store %arg7[%c0_7, %c0_8, %c0_9], %15 {strides = array<i32>} : memref<1x8x32xbf16, #tpu.memory_space<vmem>>, vector<1x8x32xbf16>,
    %16 = vector.extract_strided_slice %8 {offsets = [0, 32], sizes = [8, 128], strides = [1, 1]} : vector<8x160xf32> to vector<8x128xf32>
    %cst_10 = arith.constant 0.000000e+00 : f32
    %17 = vector.broadcast %cst_10 : f32 to vector<8x128xf32>
    %18 = arith.maximumf %16, %17 : vector<8x128xf32>
    %19 = arith.truncf %18 : vector<8x128xf32> to vector<8x128xbf16>
    %c0_11 = arith.constant 0 : index
    %c0_12 = arith.constant 0 : index
    %20 = vector.load %arg5[%c0_11, %c0_12] : memref<128x16xbf16, #tpu.memory_space<vmem>>, vector<128x16xbf16>
    %cst_13 = arith.constant dense<0.000000e+00> : vector<8x16xf32>
    %21 = tpu.matmul %19, %20, %cst_13 {dimension_numbers = #tpu.dot_dimension_numbers<[1], [0], [0], [1], [0, 0, 1, 1], [], []>} : vector<8x128xbf16>, vector<128x16xbf16>, vector<8x16xf32> -> vector<8x16xf32>
    %c0_14 = arith.constant 0 : index
    %c0_15 = arith.constant 0 : index
    %22 = vector.load %arg6[%c0_14, %c0_15] : memref<1x16xf32, #tpu.memory_space<vmem>>, vector<1x16xf32>
    %23 = vector.shape_cast %22 : vector<1x16xf32> to vector<16xf32>
    %24 = vector.shape_cast %23 : vector<16xf32> to vector<1x16xf32>
    %25 = vector.broadcast %24 : vector<1x16xf32> to vector<8x16xf32>
    %26 = arith.addf %21, %25 : vector<8x16xf32>
    %27 = arith.truncf %26 : vector<8x16xf32> to vector<8x16xbf16>
    %c0_16 = arith.constant 0 : index
    %c0_17 = arith.constant 0 : index
    %c0_18 = arith.constant 0 : index
    %28 = vector.load %arg8[%c0_16, %c0_17, %c0_18] : memref<1x8x16xbf16, #tpu.memory_space<vmem>>, vector<1x8x16xbf16>
    %29 = vector.shape_cast %28 : vector<1x8x16xbf16> to vector<8x16xbf16>
    %30 = vector.shape_cast %27 : vector<8x16xbf16> to vector<1x8x16xbf16>
    tpu.vector_store %arg8[%c0_16, %c0_17, %c0_18], %30 {strides = array<i32>} : memref<1x8x16xbf16, #tpu.memory_space<vmem>>, vector<1x8x16xbf16>,
    return
  }
  func.func @transform_0(%arg0: i32, %arg1: i32) -> (i32, i32, i32) {
    %c0_i32 = arith.constant 0 : i32
    %c0_i32_0 = arith.constant 0 : i32
    return %arg0, %arg1, %c0_i32 : i32, i32, i32
  }
  func.func @transform_1(%arg0: i32, %arg1: i32) -> (i32, i32) {
    %c0_i32 = arith.constant 0 : i32
    %c0_i32_0 = arith.constant 0 : i32
    %c0_i32_1 = arith.constant 0 : i32
    return %c0_i32, %c0_i32_0 : i32, i32
  }
  func.func @transform_2(%arg0: i32, %arg1: i32) -> (i32, i32) {
    %c0_i32 = arith.constant 0 : i32
    %c0_i32_0 = arith.constant 0 : i32
    %c0_i32_1 = arith.constant 0 : i32
    return %c0_i32, %c0_i32_0 : i32, i32
  }
  func.func @transform_3(%arg0: i32, %arg1: i32) -> (i32, i32) {
    %c0_i32 = arith.constant 0 : i32
    %c0_i32_0 = arith.constant 0 : i32
    %c0_i32_1 = arith.constant 0 : i32
    return %c0_i32, %c0_i32_0 : i32, i32
  }
  func.func @transform_4(%arg0: i32, %arg1: i32) -> (i32, i32) {
    %c0_i32 = arith.constant 0 : i32
    %c0_i32_0 = arith.constant 0 : i32
    %c0_i32_1 = arith.constant 0 : i32
    return %c0_i32, %c0_i32_0 : i32, i32
  }
  func.func @transform_5(%arg0: i32, %arg1: i32) -> (i32, i32, i32) {
    %c0_i32 = arith.constant 0 : i32
    %c0_i32_0 = arith.constant 0 : i32
    return %arg0, %arg1, %c0_i32 : i32, i32, i32
  }
  func.func @transform_6(%arg0: i32, %arg1: i32) -> (i32, i32, i32) {
    %c0_i32 = arith.constant 0 : i32
    %c0_i32_0 = arith.constant 0 : i32
    return %arg0, %arg1, %c0_i32 : i32, i32, i32
  }
}

</mosaic_0001>

<bundles_post_ra>
// kernel: tpu_custom_call.1
= control target key start
LH: loop header
LB: loop body
LE: loop exit
PB: predicated region body
PF: predicated region fallthrough
CT: control target
= control target key end

     0   :  { %12 = vsyncpa [#allocation3], 0  ;;  %s1114_s0 = inlined_call_operand.vmem [shape: bf16[2,8,32], index: 0, kind: input, shape index: {}]   ;;  %s1115_s1 = inlined_call_operand.vmem [shape: bf16[32,160], index: 1, kind: input, shape index: {}]   ;;  %s1116_s2 = inlined_call_operand.vmem [shape: f32[1,160], index: 2, kind: input, shape index: {}]   ;;  %s1117_s3 = inlined_call_operand.vmem [shape: bf16[128,16], index: 3, kind: input, shape index: {}]   ;;  %s1118_s4 = inlined_call_operand.vmem [shape: f32[1,16], index: 4, kind: input, shape index: {}]   ;;  %s1119_s5 = inlined_call_operand.hbm [shape: bf16[2,8,32], index: 5, kind: output, shape index: {0}]   ;;  %s1120_s6 = inlined_call_operand.hbm [shape: bf16[2,8,16], index: 6, kind: output, shape index: {1}]  }
   0x1   :  { %14 = vsyncpa [#allocation3 + $0x1], 0 }
   0x2   :  { %15 = vsyncpa [#allocation5], 0 }
   0x3   :  { %17 = vsyncpa [#allocation5 + $0x1], 0  ;;  %s925_s21 = smov 0   ;;  %s927_s22 = smov 0  }
   0x4   :  { %s929_s23 = smov 0   ;;  %s931_s24 = smov 0  }
   0x5   :  { %s933_s25 = smov 0   ;;  %s935_s26 = smov 0  }
   0x6 LB: > { %s637_s27 = sadd.s32 4294967295, %s882_s26   ;;  %s638_s28 = sadd.s32 4294967294, %s882_s26   ;;  %s882_s26 = sphi %s935_s26, %s23_s26   ;;  %s878_s25 = sphi %s933_s25, %s1127_s25   ;;  %s874_s24 = sphi %s931_s24, %s1126_s24   ;;  %s870_s23 = sphi %s929_s23, %s1125_s23   ;;  %s866_s22 = sphi %s927_s22, %s1124_s22   ;;  %s862_s21 = sphi %s925_s21, %s1123_s21  }
   0x7   : > { %s35_s29 = sadd.s32 1, %s878_s25  ;;  %s156_s30 = sadd.s32 1, %s870_s23 }
   0x8   : > { %p37_p0 = scmp.ge.s32.totalorder %s35_s29, 2  ;;  %p166_p1 = scmp.ne.s32.totalorder %s870_s23, %s866_s22 }
   0x9   : > { %p167_p2 = scmp.eq.s32.totalorder %s637_s27, 1  ;;  %p172_p3 = scmp.ne.s32.totalorder %s866_s22, %s862_s21 }
   0xa   : > { %s1129_s29 = smov (%p37_p0, %s35_s29), 0  ;;  %p173_p5 = scmp.eq.s32.totalorder %s638_s28, 1 }
   0xb   : > { %p965_p4 = por %p167_p2, %p166_p1  ;;  %s151_s8 = ssub.s32 %s878_s25, %s1129_s29 }
   0xc   : > { %p641_p6 = scmp.ge.s32.totalorder %s882_s26, 1  ;;  %p154_p7 = scmp.eq.s32.totalorder %s151_s8, 0 }
   0xd   : > { %p972_p8 = por %p173_p5, %p172_p3  ;;  %p241_p9 = scmp.lt.s32.totalorder %s882_s26, 3 }
   0xe   : > { %s978_s10 = scalar_select %p154_p7, %s870_s23, %s156_s30  }
   0xf   : > { %p242_p10 = pnand %p641_p6, %p241_p9 }
  0x10   : > { %v758_v0 = vld [vmem:[%s1115_s1 + $0x4] ss:$8 sps:$4 sm:$0xff] (!%p242_p10)   ;;  %p278_p11 = scmp.lt.s32.totalorder (!%p242_p10), %s874_s24, 1  ;;  %v760_v1 = vld [vmem:[%s1115_s1] ss:$8 sps:$4 sm:$0xff] (!%p242_p10)   ;;  %v884_v2 = vmov (!%p242_p10), 0   ;;  %v293_v14 = vlaneseq (!%p242_p10) }
  0x11   : > { %245 = sbr.rel (%p242_p10) target bundleno = 597 (0x255), region = 40  ;;  %359 = vmatprep.mubr.bf16.mxu0 (!%p242_p10), %v884_v2  ;;  %327 = vmatprep.subr.bf16.mxu0 (!%p242_p10), %v758_v0  ;;  %v761_v3 = vld [vmem:[%s1115_s1 + $0x14] ss:$8 sps:$4 sm:$0xff] (!%p242_p10)   ;;  %v763_v4 = vld [vmem:[%s1115_s1 + $0x10] ss:$8 sps:$4 sm:$0xff] (!%p242_p10)   ;;  %vm323_vm0 = vcmask (!%p242_p10), 261120  }
  0x12   : > { %328 = vmatpush1.bf16.msra.mxu0 (!%p242_p10), %v760_v1  ;;  %v764_v6 = vld [vmem:[%s1117_s3] sm:$0xff] (!%p242_p10)   ;;  %v885_v7 = vmov (!%p242_p10), 0.0   ;;  %v765_v8 = vld [vmem:[%s1117_s3 + $0x8] sm:$0xff] (!%p242_p10)   ;;  %v766_v9 = vld [vmem:[%s1117_s3 + $0x10] sm:$0xff] (!%p242_p10)   ;;  %v294_v15 = vshrl.u32 (!%p242_p10), %v293_v14, 7  ;;  %vm886_vm1 = vmmov (!%p242_p10), 0  }
  0x13   : > { %329 = vmatprep.subr.bf16.mxu0 (!%p242_p10), %v761_v3  ;;  %674 = vmatprep.subr.bf16.mxu1 (!%p242_p10), %v885_v7  ;;  %v767_v10 = vld [vmem:[%s1117_s3 + $0x18] sm:$0xff] (!%p242_p10)   ;;  %v768_v11 = vld [vmem:[%s1117_s3 + $0x20] sm:$0xff] (!%p242_p10)   ;;  %v769_v12 = vld [vmem:[%s1117_s3 + $0x28] sm:$0xff] (!%p242_p10)   ;;  %s1025_s14 = sand.u32 (!%p242_p10), 1, %s866_s22   ;;  %vm370_vm2 = vcmask (!%p242_p10), 257024   ;;  %s887_s16 = smov (!%p242_p10), 96  }
  0x14   : > { %675 = vmatpush3.bf16.msra.mxu1 (!%p242_p10), %v764_v6  ;;  %v770_v13 = vld [vmem:[%s1117_s3 + $0x30] sm:$0xff] (!%p242_p10)   ;;  %v295_v16 = vsub.s32 (!%p242_p10), 0, %v294_v15  ;;  %v771_v17 = vld [vmem:[%s1117_s3 + $0x38] sm:$0xff] (!%p242_p10)   ;;  %v291_v18 = vld [vmem:[%s1116_s2] sm:$0x3] (!%p242_p10)  ;;  %v299_v19 = vsub.s32 (!%p242_p10), 1, %v294_v15  ;;  %690 = vmatprep.mubr.msk.bf16.mxu1 (!%p242_p10), %vm886_vm1, %v885_v7 }
  0x15   : > { %676 = vmatprep.subr.bf16.mxu1 (!%p242_p10), %v885_v7  ;;  %s642_s15 = sshll.u32 (!%p242_p10), %s1025_s14, 2  ;;  %vm405_vm3 = vcmask (!%p242_p10), 785408   ;;  %s661_s18 = sshll.u32 (!%p242_p10), %s874_s24, 6 }
  0x16   : > { %330 = vmatpush1.bf16.msra.mxu0 (!%p242_p10), %v763_v4  ;;  %v296_v20 = vrot.slane (!%p242_p10), %v291_v18, %v295_v16  ;;  %v300_v21 = vrot.slane (!%p242_p10), %v291_v18, %v299_v19  ;;  %s1036_s27 = scalar_lea.hbm (!%p242_p10), %s1119_s5, %s661_s18  ;;  %s888_s11 = smov (!%p242_p10), [#allocation2]  }
  0x17   : > { %s776_s12 = sshll.u32 (!%p242_p10), %s888_s11, 4  ;;  %s777_s12 = int_to_ptr.vmem [resolvable:$false] %s776_s12 }
  0x18   : > { %s279_s17 = scalar_select %p278_p11, %s874_s24, 1  ;;  %677 = vmatpush3.bf16.msra.mxu1 %v765_v8 }
  0x19   : > { %678 = vmatprep.subr.bf16.mxu1 %v885_v7  ;;  %s778_s13 = scalar_lea.vmem %s777_s12, 128 }
  0x1a   : > { %s644_s20 = sshll.u32 %s279_s17, 2  ;;  %s270_s17 = scalar_lea.vmem [#allocation2], %s642_s15 }
  0x1b   : > { %s284_s30 = scalar_lea.vmem %s1114_s0, %s644_s20  ;;  %s519_s28 = sshll.u32 %s270_s17, 4  ;;  %s520_s28 = int_to_ptr.vmem [resolvable:$true] %s519_s28 }
  0x1c   : > { %v286_v5 = vld [vmem:[%s284_s30] sm:$0xf]  ;;  %679 = vmatpush3.bf16.msra.mxu1 %v766_v9  ;;  %s500_s30 = scalar_lea.sflag [#allocation3], %s1025_s14  ;;  %s772_s8 = scalar_lea.vmem %s520_s28, 64 }
  0x1d   : > { %649 = vmatmul.mubr.msk.bf16.vlgmr.msra.gmra.mrb[0].mxu0 %vm323_vm0, %v286_v5  ;;  %680 = vmatprep.subr.bf16.mxu1 %v885_v7  ;;  %p773_p12 = scmp.ne.s32.totalorder %s520_s28, %s772_s8  ;;  %p779_p1 = scmp.lt.s32.totalorder %s520_s28, %s777_s12 }
  0x1e   : > { %p780_p2 = scmp.lt.s32.totalorder %s778_s13, %s772_s8 }
  0x1f   : > { %p774_p13 = pnand %p773_p12, %p965_p4 }
  0x20   : > { %681 = vmatpush3.bf16.msra.mxu1 %v767_v10  ;;  %p781_p3 = por %p780_p2, %p779_p1 }
  0x21   : > { %682 = vmatprep.subr.bf16.mxu1 %v885_v7  ;;  %p775_p0 = pneg %p774_p13 }
  0x23   : > { %p782_p5 = pnand %p781_p3, %p775_p0 }
  0x24   : > { %683 = vmatpush3.bf16.msra.mxu1 %v768_v11 }
  0x25   : > { %684 = vmatprep.subr.bf16.mxu1 %v885_v7 }
  0x28   : > { %685 = vmatpush3.bf16.msra.mxu1 %v769_v12 }
  0x29   : > { %686 = vmatprep.subr.bf16.mxu1 %v885_v7 }
  0x2c   : > { %687 = vmatpush3.bf16.msra.mxu1 %v770_v13 }
  0x2d   : > { %688 = vmatprep.subr.bf16.mxu1 %v885_v7 }
  0x30   : > { %689 = vmatpush3.bf16.msra.mxu1 %v771_v17 }
  0xf0   : > { %v361_v22 = vpop.f32.mrb[0].mxu0 }
  0xf1   : > { %v362_v23 = vadd.f32 %v361_v22, %v296_v20  ;;  %v363_v24 = vpop.f32.mrb[1].mxu0 }
  0xf2   : > { %v364_v25 = vadd.f32 %v363_v24, %v300_v21  ;;  %v365_v26 = vpop.f32.mrb[2].mxu0 }
  0xf3   : > { %v368_v27 = vmul.f32 0.33333334, %v362_v23  ;;  %v366_v28 = vpop.f32.mrb[3].mxu0  ;;  %v372_v29 = vmax.f32 %v362_v23, 0.0 }
  0xf4   : > { %v373_v31 = vmax.f32 %v364_v25, 0.0 }
  0xf5   : > { %v369_v30 = vpack.c.bf16 %v368_v27, %v368_v27  ;;  %v374_v32 = vpack.c.bf16 %v372_v29, %v372_v29 }
  0xf6   : > { %v375_v33 = vpack.c.bf16 %v373_v31, %v373_v31 }
  0xf7   : > { %401 = vrot.lane.b32.xlu0 %v374_v32, %s887_s16  ;;  %371 = vst.msk [vmem:[%s270_s17] sm:$0xf] %vm370_vm2, %v369_v30 }
  0xfb   : > { %403 = vrot.lane.b32.xlu0 %v375_v33, %s887_s16 }
 0x169   : > { %v402_v34 = vpop.permute.xlu0 %401 }
 0x16d   : > { %v404_v35 = vpop.permute.xlu0 %403 }
 0x16e   : > { %v406_v36 = vsel %vm405_vm3, %v402_v34, %v404_v35 }
 0x16f   : > { %691 = vmatmul.mubr.bf16.vlgmr.msra.gmra.mrb[0].mxu1 %v406_v36 }
 0x170   : > { %785 = shalt.err (!%p782_p5)
}
 0x171   : > { %s786_s16 = scalar_lea.hbm %s1036_s27, 64  ;;  %s790_s20 = scalar_lea.hbm %s1119_s5, 128 }
 0x172   : > { %p787_p6 = scmp.ne.s32.totalorder %s1036_s27, %s786_s16  ;;  %p791_p10 = scmp.lt.u32.totalorder %s1036_s27, %s1119_s5 }
 0x173   : > { %p792_p11 = scmp.lt.u32.totalorder %s790_s20, %s786_s16  ;;  %p794_p13 = scmp.lt.u32.totalorder %s786_s16, %s1036_s27 }
 0x174   : > { %p788_p7 = pnand %p787_p6, %p965_p4 }
 0x175   : > { %p793_p12 = por %p792_p11, %p791_p10 }
 0x176   : > { %p789_p9 = pneg %p788_p7 }
 0x177   : > { %p795_p0 = por %p794_p13, %p793_p12 }
 0x179   : > { %p796_p1 = pnand %p795_p0, %p789_p9 }
 0x17b   : > { %799 = shalt.err (!%p796_p1)
}
 0x17c   : > { %694 = dma.vmem_to_hbm [thread:$0]  (%p965_p4), %s520_s28, 64, %s1036_s27, %s500_s30   ;;  %v650_v37 = vld [vmem:[%s1118_s4] ss:$0 sm:$0xff]  ;;  %vm497_vm4 = vcmask 125952  }
 0x17d   : > { %s277_s17 = scalar_lea.vmem [#allocation4], %s642_s15  ;;  %s1066_s27 = scalar_lea.hbm %s1120_s6, %s661_s18 }
 0x17e   : > { %s533_s19 = sshll.u32 %s277_s17, 4  ;;  %s505_s15 = scalar_lea.sflag [#allocation5], %s1025_s14  ;;  %s1068_s19 = int_to_ptr.vmem [resolvable:$true] %s533_s19 }
 0x17f   : > { %s800_s28 = scalar_lea.vmem %s1068_s19, 64  ;;  %s889_s30 = smov [#allocation4]  }
 0x180   : > { %p801_p2 = scmp.ne.s32.totalorder %s1068_s19, %s800_s28  ;;  %s804_s11 = sshll.u32 %s889_s30, 4  ;;  %s805_s11 = int_to_ptr.vmem [resolvable:$false] %s804_s11 }
 0x181   : > { %s806_s24 = scalar_lea.vmem %s805_s11, 128  ;;  %p807_p6 = scmp.lt.s32.totalorder %s1068_s19, %s805_s11 }
 0x182   : > { %p802_p3 = pnand %p801_p2, %p965_p4  ;;  %p808_p7 = scmp.lt.s32.totalorder %s806_s24, %s800_s28 }
 0x184   : > { %p803_p5 = pneg %p802_p3  ;;  %p809_p9 = por %p808_p7, %p807_p6 }
 0x186   : > { %p810_p10 = pnand %p809_p9, %p803_p5 }
 0x242   : > { %v490_v38 = vpop.f32.mrb[0].mxu1 }
 0x243   : > { %v491_v39 = vadd.f32 %v650_v37, %v490_v38  ;;  %v692_v40 = vpop.f32.mrb[1].mxu1 }
 0x244   : > { %v493_v41 = vpop.f32.mrb[2].mxu1 }
 0x245   : > { %v496_v42 = vpack.c.bf16 %v491_v39, %v491_v39  ;;  %v693_v43 = vpop.f32.mrb[3].mxu1 }
 0x247   : > { %498 = vst.msk [vmem:[%s277_s17] sm:$0xf] %vm497_vm4, %v496_v42 }
 0x248   : > { %813 = shalt.err (!%p810_p10)
}
 0x249   : > { %s814_s14 = scalar_lea.hbm %s1066_s27, 64  ;;  %s818_s8 = scalar_lea.hbm %s1120_s6, 128 }
 0x24a   : > { %p815_p11 = scmp.ne.s32.totalorder %s1066_s27, %s814_s14  ;;  %p819_p0 = scmp.lt.u32.totalorder %s1066_s27, %s1120_s6 }
 0x24b   : > { %p820_p1 = scmp.lt.u32.totalorder %s818_s8, %s814_s14  ;;  %p822_p3 = scmp.lt.u32.totalorder %s814_s14, %s1066_s27 }
 0x24c   : > { %p816_p12 = pnand %p815_p11, %p965_p4 }
 0x24d   : > { %p821_p2 = por %p820_p1, %p819_p0 }
 0x24e   : > { %p817_p13 = pneg %p816_p12 }
 0x24f   : > { %p823_p5 = por %p822_p3, %p821_p2 }
 0x251   : > { %p824_p6 = pnand %p823_p5, %p817_p13 }
 0x253   : > { %827 = shalt.err (!%p824_p6)
}
 0x254   : > { %695 = dma.vmem_to_hbm [thread:$0]  (%p965_p4), %s1068_s19, 64, %s1066_s27, %s505_s15  }
 0x255 PF: > { %p705_p7 = scmp.ge.s32.totalorder %s882_s26, 2  ;;  %s545_s16 = sand.u32 1, %s862_s21  }
 0x256   : > { %s546_s20 = scalar_lea.sflag [#allocation3], %s545_s16 }
 0x257   : > { %p699_p9 = pnand %p705_p7, %p972_p8 }
 0x259   : > { %853 = dma.done.wait (!%p699_p9), %s546_s20, 64  }
 0x25a   : > { %855 = vsyncadd (!%p699_p9), %s546_s20, 4294967232  ;;  %s555_s28 = scalar_lea.sflag [#allocation5], %s545_s16 }
 0x25b   : > { %857 = dma.done.wait (!%p699_p9), %s555_s28, 64  }
 0x25c   : > { %859 = vsyncadd (!%p699_p9), %s555_s28, 4294967232  ;;  %s23_s26 = sadd.s32 1, %s882_s26   ;;  %s1123_s21 = smov %s866_s22 }
 0x25d   : > { %p20_p10 = scmp.ge.s32.totalorder %s23_s26, 4   ;;  %s1124_s22 = smov %s870_s23 }
 0x25e   : > { %s1125_s23 = smov %s978_s10  ;;  %s1126_s24 = smov %s878_s25 }
 0x25f   : > { %s1127_s25 = smov %s1129_s29  ;;  %22 = sbr.rel (!%p20_p10) target bundleno = 6 (0x6), region = 92 }
 0x266   :  { %560 = vsyncpa [#allocation3], 1 }
 0x267   :  { %562 = vsyncpa [#allocation3 + $0x1], 1 }
 0x268   :  { %563 = vsyncpa [#allocation5], 1 }
 0x269   :  { %565 = vsyncpa [#allocation5 + $0x1], 1 }

</bundles_post_ra>
